<compile_context>
chip_gen: v7x
topology: tpu7x:2x2x1
jax: 0.10.0
libtpu: 0.0.40
codegen_flags: <defaults>
</compile_context>

<pallas_src>
import jax
import jax.numpy as jnp
from jax import lax
from jax.experimental import pallas as pl
from jax.experimental.pallas import tpu as pltpu


# ----------------------------------------------------------------------------
# Hardware-aware VMEM configuration (computed once at import).
# ----------------------------------------------------------------------------
def _vmem_config():
    cap = 64 << 20                      # conservative fallback (v7x physical)
    try:
        info = pltpu.get_tpu_info()
        cap = int(getattr(info, "vmem_capacity_bytes", cap))
    except Exception:
        pass
    limit = min((cap * 3) // 4, 100 << 20)   # v5e/v6e: ~96 MiB, v7x: ~48 MiB
    budget = max(6 << 20, limit // 8)        # per-kernel block budget
    return limit, budget


_VMEM_LIMIT, _TILE_BUDGET = _vmem_config()


def _rup(v, m):
    return ((v + m - 1) // m) * m


# ----------------------------------------------------------------------------
# Kernel 1: complex spectral mode mixing, mode-last / lane-dense (VPU FMAs).
#   xr_ref, xi_ref: (B, Cin, TM)     real / imag of the gathered corner modes
#   wr_ref, wi_ref: (Cin, Cout, TM)  real / imag spectral weights (mode-last)
#   or_ref, oi_ref: (B, Cout, TM)    real / imag outputs
# ----------------------------------------------------------------------------
def spectral_mix_kernel(xr_ref, xi_ref, wr_ref, wi_ref, or_ref, oi_ref):
    xr = xr_ref[...]
    xi = xi_ref[...]
    wr = wr_ref[...]
    wi = wi_ref[...]
    cin = xr.shape[1]
    acc_re = jnp.zeros(or_ref.shape, jnp.float32)
    acc_im = jnp.zeros(oi_ref.shape, jnp.float32)
    # Static unroll over the small channel contraction; every op below is a
    # full-lane-width VPU FMA on (B, Cout, TM) with TM on the lane axis.
    for i in range(cin):
        xri = xr[:, i:i + 1, :]          # (B, 1, TM)
        xii = xi[:, i:i + 1, :]
        wri = wr[i:i + 1]                # (1, Cout, TM)
        wii = wi[i:i + 1]
        acc_re = acc_re + xri * wri - xii * wii
        acc_im = acc_im + xri * wii + xii * wri
    or_ref[...] = acc_re
    oi_ref[...] = acc_im


# ----------------------------------------------------------------------------
# Kernel 2: 1x1 conv (channel matmul + bias) + residual add of the spectral
# branch + exact-erf GELU, fused.  Lane-dense spatial tile per grid step.
# ----------------------------------------------------------------------------
def pointwise_conv_add_gelu_kernel(x_ref, w_ref, b_ref, x1_ref, o_ref):
    x = x_ref[0]                                     # (Cin, TN)
    w = w_ref[...]                                   # (Cout, Cin)
    conv = jnp.dot(w, x, preferred_element_type=jnp.float32) + b_ref[...]
    y = x1_ref[0] + conv                             # (Cout, TN)
    inv_sqrt2 = jnp.float32(0.7071067811865476)
    o_ref[0] = 0.5 * y * (1.0 + lax.erf(y * inv_sqrt2))


# ----------------------------------------------------------------------------
# Lane-tile selection.  Tiles are divisors of the lane extent (no padding);
# VMEM estimates account for (8,128) sublane/lane physical tiling and the 2x
# double-buffering of pipelined blocks.
# ----------------------------------------------------------------------------
def _spectral_lane_tile(M, B, Cin, Cout, budget_bytes):
    if M % 128 != 0:
        return M                         # full-extent lane block (tiny-M case)
    per_lane = 2 * 4 * (2 * B * _rup(Cin, 8)
                        + 2 * Cin * _rup(Cout, 8)
                        + 2 * B * _rup(Cout, 8))
    cap = max(128, (budget_bytes // per_lane) // 128 * 128)
    best = 128
    d = 128
    while d <= M:
        if M % d == 0 and d <= cap:
            best = d
        d += 128
    # Prefer >=2 blocks on the parallel axis when M allows (v7x has 2 TCs).
    if best == M and M >= 256:
        d = (M // 2 // 128) * 128
        while d >= 128 and M % d != 0:
            d -= 128
        if d >= 128:
            best = d
    return best


def _pointwise_lane_tile(HW, Cin, Cout, budget_bytes):
    if HW % 128 != 0:
        return HW                        # full-extent lane block
    per_lane = 2 * 4 * (_rup(Cin, 8) + 2 * _rup(Cout, 8))
    cap = max(128, (budget_bytes // per_lane) // 128 * 128)
    best = 128
    d = 128
    while d <= min(HW, cap):
        if HW % d == 0:
            best = d
        d += 128
    return best


# ----------------------------------------------------------------------------
# Loop-invariant weight packing (done once, outside the forward pass).
# Mode-last layout: (Cin, Cout, 2*m1*m2) real & imag, no transposes, no pads.
# ----------------------------------------------------------------------------
def pack_spectral_weights(w1, w2):
    Cin, Cout, m1, m2 = w1.shape
    wk = jnp.concatenate([w1, w2], axis=2).reshape(Cin, Cout, 2 * m1 * m2)
    return (jnp.real(wk).astype(jnp.float32),
            jnp.imag(wk).astype(jnp.float32))


# ----------------------------------------------------------------------------
# Wrappers
# ----------------------------------------------------------------------------
def spectral_conv2d(x, wr_packed, wi_packed, m1, m2, Cout):
    """SpectralConv2d forward (feature_transform=False)."""
    B, Cin, H, W = x.shape
    Wf = W // 2 + 1
    M = 2 * m1 * m2

    x_ft = jnp.fft.rfft2(x)                                      # (B,Cin,H,Wf)

    # Gather both Fourier corner blocks, keep modes LAST (lane axis).
    xm = jnp.concatenate(
        [x_ft[:, :, :m1, :m2], x_ft[:, :, H - m1:, :m2]],
        axis=2).reshape(B, Cin, M)
    xr = jnp.real(xm).astype(jnp.float32)
    xi = jnp.imag(xm).astype(jnp.float32)

    TM = _spectral_lane_tile(M, B, Cin, Cout, _TILE_BUDGET)

    out_re, out_im = pl.pallas_call(
        spectral_mix_kernel,
        out_shape=(jax.ShapeDtypeStruct((B, Cout, M), jnp.float32),
                   jax.ShapeDtypeStruct((B, Cout, M), jnp.float32)),
        grid=(M // TM,),
        in_specs=[
            pl.BlockSpec((B, Cin, TM), lambda m: (0, 0, m)),
            pl.BlockSpec((B, Cin, TM), lambda m: (0, 0, m)),
            pl.BlockSpec((Cin, Cout, TM), lambda m: (0, 0, m)),
            pl.BlockSpec((Cin, Cout, TM), lambda m: (0, 0, m)),
        ],
        out_specs=(
            pl.BlockSpec((B, Cout, TM), lambda m: (0, 0, m)),
            pl.BlockSpec((B, Cout, TM), lambda m: (0, 0, m)),
        ),
        compiler_params=pltpu.CompilerParams(
            dimension_semantics=("parallel",),
            vmem_limit_bytes=_VMEM_LIMIT),
    )(xr, xi, wr_packed, wi_packed)

    out_c = lax.complex(out_re, out_im).reshape(B, Cout, 2 * m1, m2)

    # Scatter back in the same order as PyTorch (second set overwrites any
    # overlap if 2*m1 > H, matching torch semantics).
    out_ft = jnp.zeros((B, Cout, H, Wf), dtype=jnp.complex64)
    out_ft = out_ft.at[:, :, :m1, :m2].set(out_c[:, :, :m1])
    out_ft = out_ft.at[:, :, H - m1:, :m2].set(out_c[:, :, m1:])
    return jnp.fft.irfft2(out_ft, s=(H, W)).astype(jnp.float32)


def fno_layer_forward(x, params, m1, m2):
    """FNO_Layer forward: gelu(SpectralConv2d(x) + Conv2d_1x1(x))."""
    B, Cin, H, W = x.shape
    Cout = params["conv_w"].shape[0]
    HW = H * W
    assert m1 <= H and m2 <= W // 2 + 1

    x1 = spectral_conv2d(x, params["w_spec_re"], params["w_spec_im"],
                         m1, m2, Cout)                           # (B,Cout,H,W)

    # Free reshapes (NCHW is contiguous over H*W); no padding — TN divides HW.
    x_flat = x.reshape(B, Cin, HW)
    x1_flat = x1.reshape(B, Cout, HW)
    TN = _pointwise_lane_tile(HW, Cin, Cout, _TILE_BUDGET)

    y = pl.pallas_call(
        pointwise_conv_add_gelu_kernel,
        out_shape=jax.ShapeDtypeStruct((B, Cout, HW), jnp.float32),
        grid=(B, HW // TN),
        in_specs=[
            pl.BlockSpec((1, Cin, TN), lambda b, n: (b, 0, n)),
            pl.BlockSpec((Cout, Cin), lambda b, n: (0, 0)),
            pl.BlockSpec((Cout, 1), lambda b, n: (0, 0)),
            pl.BlockSpec((1, Cout, TN), lambda b, n: (b, 0, n)),
        ],
        out_specs=pl.BlockSpec((1, Cout, TN), lambda b, n: (b, 0, n)),
        input_output_aliases={3: 0},     # reuse x1's HBM buffer for the output
        compiler_params=pltpu.CompilerParams(
            dimension_semantics=("parallel", "parallel"),
            vmem_limit_bytes=_VMEM_LIMIT),
    )(x_flat, params["conv_w"], params["conv_b"], x1_flat)

    return y.reshape(B, Cout, H, W)


# ----------------------------------------------------------------------------
# Pure-JAX reference (mirrors the PyTorch forward exactly)
# ----------------------------------------------------------------------------
def fno_layer_reference(x, params, m1, m2):
    B, Cin, H, W = x.shape
    w1, w2 = params["w1"], params["w2"]
    Cout = w1.shape[1]
    Wf = W // 2 + 1

    x_ft = jnp.fft.rfft2(x)
    out_ft = jnp.zeros((B, Cout, H, Wf), jnp.complex64)
    out_ft = out_ft.at[:, :, :m1, :m2].set(
        jnp.einsum("bixy,ioxy->boxy", x_ft[:, :, :m1, :m2], w1))
    out_ft = out_ft.at[:, :, H - m1:, :m2].set(
        jnp.einsum("bixy,ioxy->boxy", x_ft[:, :, H - m1:, :m2], w2))
    x1 = jnp.fft.irfft2(out_ft, s=(H, W)).astype(jnp.float32)

    x2 = jnp.einsum("oi,bihw->bohw", params["conv_w"], x) \
        + params["conv_b"].reshape(1, Cout, 1, 1)

    y = x1 + x2
    return 0.5 * y * (1.0 + jax.scipy.special.erf(y * jnp.float32(0.7071067811865476)))


# ----------------------------------------------------------------------------
# Main
# ----------------------------------------------------------------------------
if __name__ == "__main__":
    key = jax.random.PRNGKey(0)
    B, C, H, W = 2, 8, 16, 16          # batch, hidden_dim (=hidden_dim_out), spatial
    m1, m2 = 4, 4                      # modes (m1 <= H, m2 <= W//2 + 1)
    Cin = Cout = C

    k1, k2, k3, k4, k5, k6, k7 = jax.random.split(key, 7)
    scale = 1.0 / (Cin * Cout)

    # SpectralConv2d complex weights: scale * rand(...) (uniform in [0,1))
    w1 = (scale * (jax.random.uniform(k1, (Cin, Cout, m1, m2), jnp.float32)
                   + 1j * jax.random.uniform(k2, (Cin, Cout, m1, m2), jnp.float32))
          ).astype(jnp.complex64)
    w2 = (scale * (jax.random.uniform(k3, (Cin, Cout, m1, m2), jnp.float32)
                   + 1j * jax.random.uniform(k4, (Cin, Cout, m1, m2), jnp.float32))
          ).astype(jnp.complex64)

    # 1x1 Conv2d weights/bias (deterministic synthetic init)
    conv_w = jax.random.normal(k5, (Cout, Cin), jnp.float32) * 0.1
    conv_b = jax.random.normal(k6, (Cout, 1), jnp.float32) * 0.1

    # Loop-invariant, mode-last spectral weight packing (done once).
    w_spec_re, w_spec_im = pack_spectral_weights(w1, w2)

    params = {
        "w1": w1, "w2": w2,
        "conv_w": conv_w, "conv_b": conv_b,
        "w_spec_re": w_spec_re, "w_spec_im": w_spec_im,
    }

    x = jax.random.normal(k7, (B, C, H, W), jnp.float32)

    fwd = jax.jit(fno_layer_forward, static_argnums=(2, 3))
    out = jax.block_until_ready(fwd(x, params, m1, m2))
    ref = jax.block_until_ready(fno_layer_reference(x, params, m1, m2))

    assert out.shape == (B, Cout, H, W), out.shape
    assert out.dtype == jnp.float32
    assert jnp.allclose(out, ref, atol=1e-4, rtol=1e-4), \
        float(jnp.max(jnp.abs(out - ref)))

    print("KERNEL_OK")
</pallas_src>

<mosaic_0001>
module attributes {stable_mosaic.version = 11 : i64} {
  func.func @spectral_mix_kernel(%arg0: i32, %arg1: memref<2x8x32xf32, #tpu.memory_space<vmem>>, %arg2: memref<2x8x32xf32, #tpu.memory_space<vmem>>, %arg3: memref<8x8x32xf32, #tpu.memory_space<vmem>>, %arg4: memref<8x8x32xf32, #tpu.memory_space<vmem>>, %arg5: memref<2x8x32xf32, #tpu.memory_space<vmem>>, %arg6: memref<2x8x32xf32, #tpu.memory_space<vmem>>) attributes {dimension_semantics = [#tpu.dimension_semantics<parallel>], iteration_bounds = array<i64: 1>, scalar_prefetch = 0 : i64, scratch_operands = 0 : i64, tpu.core_type = #tpu.core_type<tc>, window_params = [{transform_indices = @transform_0, window_bounds = array<i64: 2, 8, 32>}, {transform_indices = @transform_1, window_bounds = array<i64: 2, 8, 32>}, {transform_indices = @transform_2, window_bounds = array<i64: 8, 8, 32>}, {transform_indices = @transform_3, window_bounds = array<i64: 8, 8, 32>}, {transform_indices = @transform_4, window_bounds = array<i64: 2, 8, 32>}, {transform_indices = @transform_5, window_bounds = array<i64: 2, 8, 32>}]} {
    %c0 = arith.constant 0 : index
    %c0_0 = arith.constant 0 : index
    %c0_1 = arith.constant 0 : index
    %0 = vector.load %arg1[%c0, %c0_0, %c0_1] : memref<2x8x32xf32, #tpu.memory_space<vmem>>, vector<2x8x32xf32>
    %c0_2 = arith.constant 0 : index
    %c0_3 = arith.constant 0 : index
    %c0_4 = arith.constant 0 : index
    %1 = vector.load %arg2[%c0_2, %c0_3, %c0_4] : memref<2x8x32xf32, #tpu.memory_space<vmem>>, vector<2x8x32xf32>
    %c0_5 = arith.constant 0 : index
    %c0_6 = arith.constant 0 : index
    %c0_7 = arith.constant 0 : index
    %2 = vector.load %arg3[%c0_5, %c0_6, %c0_7] : memref<8x8x32xf32, #tpu.memory_space<vmem>>, vector<8x8x32xf32>
    %c0_8 = arith.constant 0 : index
    %c0_9 = arith.constant 0 : index
    %c0_10 = arith.constant 0 : index
    %3 = vector.load %arg4[%c0_8, %c0_9, %c0_10] : memref<8x8x32xf32, #tpu.memory_space<vmem>>, vector<8x8x32xf32>
    %cst = arith.constant 0.000000e+00 : f32
    %4 = vector.broadcast %cst : f32 to vector<2x8x32xf32>
    %cst_11 = arith.constant 0.000000e+00 : f32
    %5 = vector.broadcast %cst_11 : f32 to vector<2x8x32xf32>
    %6 = vector.extract_strided_slice %0 {offsets = [0, 0, 0], sizes = [2, 1, 32], strides = [1, 1, 1]} : vector<2x8x32xf32> to vector<2x1x32xf32>
    %7 = vector.extract_strided_slice %1 {offsets = [0, 0, 0], sizes = [2, 1, 32], strides = [1, 1, 1]} : vector<2x8x32xf32> to vector<2x1x32xf32>
    %8 = vector.extract_strided_slice %2 {offsets = [0, 0, 0], sizes = [1, 8, 32], strides = [1, 1, 1]} : vector<8x8x32xf32> to vector<1x8x32xf32>
    %9 = vector.extract_strided_slice %3 {offsets = [0, 0, 0], sizes = [1, 8, 32], strides = [1, 1, 1]} : vector<8x8x32xf32> to vector<1x8x32xf32>
    %10 = vector.broadcast %6 : vector<2x1x32xf32> to vector<2x8x32xf32>
    %11 = vector.broadcast %8 : vector<1x8x32xf32> to vector<2x8x32xf32>
    %12 = arith.mulf %10, %11 : vector<2x8x32xf32>
    %13 = arith.addf %4, %12 : vector<2x8x32xf32>
    %14 = vector.broadcast %7 : vector<2x1x32xf32> to vector<2x8x32xf32>
    %15 = vector.broadcast %9 : vector<1x8x32xf32> to vector<2x8x32xf32>
    %16 = arith.mulf %14, %15 : vector<2x8x32xf32>
    %17 = arith.subf %13, %16 : vector<2x8x32xf32>
    %18 = vector.broadcast %6 : vector<2x1x32xf32> to vector<2x8x32xf32>
    %19 = vector.broadcast %9 : vector<1x8x32xf32> to vector<2x8x32xf32>
    %20 = arith.mulf %18, %19 : vector<2x8x32xf32>
    %21 = arith.addf %5, %20 : vector<2x8x32xf32>
    %22 = vector.broadcast %7 : vector<2x1x32xf32> to vector<2x8x32xf32>
    %23 = vector.broadcast %8 : vector<1x8x32xf32> to vector<2x8x32xf32>
    %24 = arith.mulf %22, %23 : vector<2x8x32xf32>
    %25 = arith.addf %21, %24 : vector<2x8x32xf32>
    %26 = vector.extract_strided_slice %0 {offsets = [0, 1, 0], sizes = [2, 1, 32], strides = [1, 1, 1]} : vector<2x8x32xf32> to vector<2x1x32xf32>
    %27 = vector.extract_strided_slice %1 {offsets = [0, 1, 0], sizes = [2, 1, 32], strides = [1, 1, 1]} : vector<2x8x32xf32> to vector<2x1x32xf32>
    %28 = vector.extract_strided_slice %2 {offsets = [1, 0, 0], sizes = [1, 8, 32], strides = [1, 1, 1]} : vector<8x8x32xf32> to vector<1x8x32xf32>
    %29 = vector.extract_strided_slice %3 {offsets = [1, 0, 0], sizes = [1, 8, 32], strides = [1, 1, 1]} : vector<8x8x32xf32> to vector<1x8x32xf32>
    %30 = vector.broadcast %26 : vector<2x1x32xf32> to vector<2x8x32xf32>
    %31 = vector.broadcast %28 : vector<1x8x32xf32> to vector<2x8x32xf32>
    %32 = arith.mulf %30, %31 : vector<2x8x32xf32>
    %33 = arith.addf %17, %32 : vector<2x8x32xf32>
    %34 = vector.broadcast %27 : vector<2x1x32xf32> to vector<2x8x32xf32>
    %35 = vector.broadcast %29 : vector<1x8x32xf32> to vector<2x8x32xf32>
    %36 = arith.mulf %34, %35 : vector<2x8x32xf32>
    %37 = arith.subf %33, %36 : vector<2x8x32xf32>
    %38 = vector.broadcast %26 : vector<2x1x32xf32> to vector<2x8x32xf32>
    %39 = vector.broadcast %29 : vector<1x8x32xf32> to vector<2x8x32xf32>
    %40 = arith.mulf %38, %39 : vector<2x8x32xf32>
    %41 = arith.addf %25, %40 : vector<2x8x32xf32>
    %42 = vector.broadcast %27 : vector<2x1x32xf32> to vector<2x8x32xf32>
    %43 = vector.broadcast %28 : vector<1x8x32xf32> to vector<2x8x32xf32>
    %44 = arith.mulf %42, %43 : vector<2x8x32xf32>
    %45 = arith.addf %41, %44 : vector<2x8x32xf32>
    %46 = vector.extract_strided_slice %0 {offsets = [0, 2, 0], sizes = [2, 1, 32], strides = [1, 1, 1]} : vector<2x8x32xf32> to vector<2x1x32xf32>
    %47 = vector.extract_strided_slice %1 {offsets = [0, 2, 0], sizes = [2, 1, 32], strides = [1, 1, 1]} : vector<2x8x32xf32> to vector<2x1x32xf32>
    %48 = vector.extract_strided_slice %2 {offsets = [2, 0, 0], sizes = [1, 8, 32], strides = [1, 1, 1]} : vector<8x8x32xf32> to vector<1x8x32xf32>
    %49 = vector.extract_strided_slice %3 {offsets = [2, 0, 0], sizes = [1, 8, 32], strides = [1, 1, 1]} : vector<8x8x32xf32> to vector<1x8x32xf32>
    %50 = vector.broadcast %46 : vector<2x1x32xf32> to vector<2x8x32xf32>
    %51 = vector.broadcast %48 : vector<1x8x32xf32> to vector<2x8x32xf32>
    %52 = arith.mulf %50, %51 : vector<2x8x32xf32>
    %53 = arith.addf %37, %52 : vector<2x8x32xf32>
    %54 = vector.broadcast %47 : vector<2x1x32xf32> to vector<2x8x32xf32>
    %55 = vector.broadcast %49 : vector<1x8x32xf32> to vector<2x8x32xf32>
    %56 = arith.mulf %54, %55 : vector<2x8x32xf32>
    %57 = arith.subf %53, %56 : vector<2x8x32xf32>
    %58 = vector.broadcast %46 : vector<2x1x32xf32> to vector<2x8x32xf32>
    %59 = vector.broadcast %49 : vector<1x8x32xf32> to vector<2x8x32xf32>
    %60 = arith.mulf %58, %59 : vector<2x8x32xf32>
    %61 = arith.addf %45, %60 : vector<2x8x32xf32>
    %62 = vector.broadcast %47 : vector<2x1x32xf32> to vector<2x8x32xf32>
    %63 = vector.broadcast %48 : vector<1x8x32xf32> to vector<2x8x32xf32>
    %64 = arith.mulf %62, %63 : vector<2x8x32xf32>
    %65 = arith.addf %61, %64 : vector<2x8x32xf32>
    %66 = vector.extract_strided_slice %0 {offsets = [0, 3, 0], sizes = [2, 1, 32], strides = [1, 1, 1]} : vector<2x8x32xf32> to vector<2x1x32xf32>
    %67 = vector.extract_strided_slice %1 {offsets = [0, 3, 0], sizes = [2, 1, 32], strides = [1, 1, 1]} : vector<2x8x32xf32> to vector<2x1x32xf32>
    %68 = vector.extract_strided_slice %2 {offsets = [3, 0, 0], sizes = [1, 8, 32], strides = [1, 1, 1]} : vector<8x8x32xf32> to vector<1x8x32xf32>
    %69 = vector.extract_strided_slice %3 {offsets = [3, 0, 0], sizes = [1, 8, 32], strides = [1, 1, 1]} : vector<8x8x32xf32> to vector<1x8x32xf32>
    %70 = vector.broadcast %66 : vector<2x1x32xf32> to vector<2x8x32xf32>
    %71 = vector.broadcast %68 : vector<1x8x32xf32> to vector<2x8x32xf32>
    %72 = arith.mulf %70, %71 : vector<2x8x32xf32>
    %73 = arith.addf %57, %72 : vector<2x8x32xf32>
    %74 = vector.broadcast %67 : vector<2x1x32xf32> to vector<2x8x32xf32>
    %75 = vector.broadcast %69 : vector<1x8x32xf32> to vector<2x8x32xf32>
    %76 = arith.mulf %74, %75 : vector<2x8x32xf32>
    %77 = arith.subf %73, %76 : vector<2x8x32xf32>
    %78 = vector.broadcast %66 : vector<2x1x32xf32> to vector<2x8x32xf32>
    %79 = vector.broadcast %69 : vector<1x8x32xf32> to vector<2x8x32xf32>
    %80 = arith.mulf %78, %79 : vector<2x8x32xf32>
    %81 = arith.addf %65, %80 : vector<2x8x32xf32>
    %82 = vector.broadcast %67 : vector<2x1x32xf32> to vector<2x8x32xf32>
    %83 = vector.broadcast %68 : vector<1x8x32xf32> to vector<2x8x32xf32>
    %84 = arith.mulf %82, %83 : vector<2x8x32xf32>
    %85 = arith.addf %81, %84 : vector<2x8x32xf32>
    %86 = vector.extract_strided_slice %0 {offsets = [0, 4, 0], sizes = [2, 1, 32], strides = [1, 1, 1]} : vector<2x8x32xf32> to vector<2x1x32xf32>
    %87 = vector.extract_strided_slice %1 {offsets = [0, 4, 0], sizes = [2, 1, 32], strides = [1, 1, 1]} : vector<2x8x32xf32> to vector<2x1x32xf32>
    %88 = vector.extract_strided_slice %2 {offsets = [4, 0, 0], sizes = [1, 8, 32], strides = [1, 1, 1]} : vector<8x8x32xf32> to vector<1x8x32xf32>
    %89 = vector.extract_strided_slice %3 {offsets = [4, 0, 0], sizes = [1, 8, 32], strides = [1, 1, 1]} : vector<8x8x32xf32> to vector<1x8x32xf32>
    %90 = vector.broadcast %86 : vector<2x1x32xf32> to vector<2x8x32xf32>
    %91 = vector.broadcast %88 : vector<1x8x32xf32> to vector<2x8x32xf32>
    %92 = arith.mulf %90, %91 : vector<2x8x32xf32>
    %93 = arith.addf %77, %92 : vector<2x8x32xf32>
    %94 = vector.broadcast %87 : vector<2x1x32xf32> to vector<2x8x32xf32>
    %95 = vector.broadcast %89 : vector<1x8x32xf32> to vector<2x8x32xf32>
    %96 = arith.mulf %94, %95 : vector<2x8x32xf32>
    %97 = arith.subf %93, %96 : vector<2x8x32xf32>
    %98 = vector.broadcast %86 : vector<2x1x32xf32> to vector<2x8x32xf32>
    %99 = vector.broadcast %89 : vector<1x8x32xf32> to vector<2x8x32xf32>
    %100 = arith.mulf %98, %99 : vector<2x8x32xf32>
    %101 = arith.addf %85, %100 : vector<2x8x32xf32>
    %102 = vector.broadcast %87 : vector<2x1x32xf32> to vector<2x8x32xf32>
    %103 = vector.broadcast %88 : vector<1x8x32xf32> to vector<2x8x32xf32>
    %104 = arith.mulf %102, %103 : vector<2x8x32xf32>
    %105 = arith.addf %101, %104 : vector<2x8x32xf32>
    %106 = vector.extract_strided_slice %0 {offsets = [0, 5, 0], sizes = [2, 1, 32], strides = [1, 1, 1]} : vector<2x8x32xf32> to vector<2x1x32xf32>
    %107 = vector.extract_strided_slice %1 {offsets = [0, 5, 0], sizes = [2, 1, 32], strides = [1, 1, 1]} : vector<2x8x32xf32> to vector<2x1x32xf32>
    %108 = vector.extract_strided_slice %2 {offsets = [5, 0, 0], sizes = [1, 8, 32], strides = [1, 1, 1]} : vector<8x8x32xf32> to vector<1x8x32xf32>
    %109 = vector.extract_strided_slice %3 {offsets = [5, 0, 0], sizes = [1, 8, 32], strides = [1, 1, 1]} : vector<8x8x32xf32> to vector<1x8x32xf32>
    %110 = vector.broadcast %106 : vector<2x1x32xf32> to vector<2x8x32xf32>
    %111 = vector.broadcast %108 : vector<1x8x32xf32> to vector<2x8x32xf32>
    %112 = arith.mulf %110, %111 : vector<2x8x32xf32>
    %113 = arith.addf %97, %112 : vector<2x8x32xf32>
    %114 = vector.broadcast %107 : vector<2x1x32xf32> to vector<2x8x32xf32>
    %115 = vector.broadcast %109 : vector<1x8x32xf32> to vector<2x8x32xf32>
    %116 = arith.mulf %114, %115 : vector<2x8x32xf32>
    %117 = arith.subf %113, %116 : vector<2x8x32xf32>
    %118 = vector.broadcast %106 : vector<2x1x32xf32> to vector<2x8x32xf32>
    %119 = vector.broadcast %109 : vector<1x8x32xf32> to vector<2x8x32xf32>
    %120 = arith.mulf %118, %119 : vector<2x8x32xf32>
    %121 = arith.addf %105, %120 : vector<2x8x32xf32>
    %122 = vector.broadcast %107 : vector<2x1x32xf32> to vector<2x8x32xf32>
    %123 = vector.broadcast %108 : vector<1x8x32xf32> to vector<2x8x32xf32>
    %124 = arith.mulf %122, %123 : vector<2x8x32xf32>
    %125 = arith.addf %121, %124 : vector<2x8x32xf32>
    %126 = vector.extract_strided_slice %0 {offsets = [0, 6, 0], sizes = [2, 1, 32], strides = [1, 1, 1]} : vector<2x8x32xf32> to vector<2x1x32xf32>
    %127 = vector.extract_strided_slice %1 {offsets = [0, 6, 0], sizes = [2, 1, 32], strides = [1, 1, 1]} : vector<2x8x32xf32> to vector<2x1x32xf32>
    %128 = vector.extract_strided_slice %2 {offsets = [6, 0, 0], sizes = [1, 8, 32], strides = [1, 1, 1]} : vector<8x8x32xf32> to vector<1x8x32xf32>
    %129 = vector.extract_strided_slice %3 {offsets = [6, 0, 0], sizes = [1, 8, 32], strides = [1, 1, 1]} : vector<8x8x32xf32> to vector<1x8x32xf32>
    %130 = vector.broadcast %126 : vector<2x1x32xf32> to vector<2x8x32xf32>
    %131 = vector.broadcast %128 : vector<1x8x32xf32> to vector<2x8x32xf32>
    %132 = arith.mulf %130, %131 : vector<2x8x32xf32>
    %133 = arith.addf %117, %132 : vector<2x8x32xf32>
    %134 = vector.broadcast %127 : vector<2x1x32xf32> to vector<2x8x32xf32>
    %135 = vector.broadcast %129 : vector<1x8x32xf32> to vector<2x8x32xf32>
    %136 = arith.mulf %134, %135 : vector<2x8x32xf32>
    %137 = arith.subf %133, %136 : vector<2x8x32xf32>
    %138 = vector.broadcast %126 : vector<2x1x32xf32> to vector<2x8x32xf32>
    %139 = vector.broadcast %129 : vector<1x8x32xf32> to vector<2x8x32xf32>
    %140 = arith.mulf %138, %139 : vector<2x8x32xf32>
    %141 = arith.addf %125, %140 : vector<2x8x32xf32>
    %142 = vector.broadcast %127 : vector<2x1x32xf32> to vector<2x8x32xf32>
    %143 = vector.broadcast %128 : vector<1x8x32xf32> to vector<2x8x32xf32>
    %144 = arith.mulf %142, %143 : vector<2x8x32xf32>
    %145 = arith.addf %141, %144 : vector<2x8x32xf32>
    %146 = vector.extract_strided_slice %0 {offsets = [0, 7, 0], sizes = [2, 1, 32], strides = [1, 1, 1]} : vector<2x8x32xf32> to vector<2x1x32xf32>
    %147 = vector.extract_strided_slice %1 {offsets = [0, 7, 0], sizes = [2, 1, 32], strides = [1, 1, 1]} : vector<2x8x32xf32> to vector<2x1x32xf32>
    %148 = vector.extract_strided_slice %2 {offsets = [7, 0, 0], sizes = [1, 8, 32], strides = [1, 1, 1]} : vector<8x8x32xf32> to vector<1x8x32xf32>
    %149 = vector.extract_strided_slice %3 {offsets = [7, 0, 0], sizes = [1, 8, 32], strides = [1, 1, 1]} : vector<8x8x32xf32> to vector<1x8x32xf32>
    %150 = vector.broadcast %146 : vector<2x1x32xf32> to vector<2x8x32xf32>
    %151 = vector.broadcast %148 : vector<1x8x32xf32> to vector<2x8x32xf32>
    %152 = arith.mulf %150, %151 : vector<2x8x32xf32>
    %153 = arith.addf %137, %152 : vector<2x8x32xf32>
    %154 = vector.broadcast %147 : vector<2x1x32xf32> to vector<2x8x32xf32>
    %155 = vector.broadcast %149 : vector<1x8x32xf32> to vector<2x8x32xf32>
    %156 = arith.mulf %154, %155 : vector<2x8x32xf32>
    %157 = arith.subf %153, %156 : vector<2x8x32xf32>
    %158 = vector.broadcast %146 : vector<2x1x32xf32> to vector<2x8x32xf32>
    %159 = vector.broadcast %149 : vector<1x8x32xf32> to vector<2x8x32xf32>
    %160 = arith.mulf %158, %159 : vector<2x8x32xf32>
    %161 = arith.addf %145, %160 : vector<2x8x32xf32>
    %162 = vector.broadcast %147 : vector<2x1x32xf32> to vector<2x8x32xf32>
    %163 = vector.broadcast %148 : vector<1x8x32xf32> to vector<2x8x32xf32>
    %164 = arith.mulf %162, %163 : vector<2x8x32xf32>
    %165 = arith.addf %161, %164 : vector<2x8x32xf32>
    %c0_12 = arith.constant 0 : index
    %c0_13 = arith.constant 0 : index
    %c0_14 = arith.constant 0 : index
    %166 = vector.load %arg5[%c0_12, %c0_13, %c0_14] : memref<2x8x32xf32, #tpu.memory_space<vmem>>, vector<2x8x32xf32>
    tpu.vector_store %arg5[%c0_12, %c0_13, %c0_14], %157 {strides = array<i32>} : memref<2x8x32xf32, #tpu.memory_space<vmem>>, vector<2x8x32xf32>,
    %c0_15 = arith.constant 0 : index
    %c0_16 = arith.constant 0 : index
    %c0_17 = arith.constant 0 : index
    %167 = vector.load %arg6[%c0_15, %c0_16, %c0_17] : memref<2x8x32xf32, #tpu.memory_space<vmem>>, vector<2x8x32xf32>
    tpu.vector_store %arg6[%c0_15, %c0_16, %c0_17], %165 {strides = array<i32>} : memref<2x8x32xf32, #tpu.memory_space<vmem>>, vector<2x8x32xf32>,
    return
  }
  func.func @transform_0(%arg0: i32) -> (i32, i32, i32) {
    %c0_i32 = arith.constant 0 : i32
    %c0_i32_0 = arith.constant 0 : i32
    %c0_i32_1 = arith.constant 0 : i32
    return %c0_i32, %c0_i32_0, %arg0 : i32, i32, i32
  }
  func.func @transform_1(%arg0: i32) -> (i32, i32, i32) {
    %c0_i32 = arith.constant 0 : i32
    %c0_i32_0 = arith.constant 0 : i32
    %c0_i32_1 = arith.constant 0 : i32
    return %c0_i32, %c0_i32_0, %arg0 : i32, i32, i32
  }
  func.func @transform_2(%arg0: i32) -> (i32, i32, i32) {
    %c0_i32 = arith.constant 0 : i32
    %c0_i32_0 = arith.constant 0 : i32
    %c0_i32_1 = arith.constant 0 : i32
    return %c0_i32, %c0_i32_0, %arg0 : i32, i32, i32
  }
  func.func @transform_3(%arg0: i32) -> (i32, i32, i32) {
    %c0_i32 = arith.constant 0 : i32
    %c0_i32_0 = arith.constant 0 : i32
    %c0_i32_1 = arith.constant 0 : i32
    return %c0_i32, %c0_i32_0, %arg0 : i32, i32, i32
  }
  func.func @transform_4(%arg0: i32) -> (i32, i32, i32) {
    %c0_i32 = arith.constant 0 : i32
    %c0_i32_0 = arith.constant 0 : i32
    %c0_i32_1 = arith.constant 0 : i32
    return %c0_i32, %c0_i32_0, %arg0 : i32, i32, i32
  }
  func.func @transform_5(%arg0: i32) -> (i32, i32, i32) {
    %c0_i32 = arith.constant 0 : i32
    %c0_i32_0 = arith.constant 0 : i32
    %c0_i32_1 = arith.constant 0 : i32
    return %c0_i32, %c0_i32_0, %arg0 : i32, i32, i32
  }
}

module attributes {stable_mosaic.version = 11 : i64} {
  func.func @pointwise_conv_add_gelu_kernel(%arg0: i32, %arg1: i32, %arg2: memref<1x8x256xf32, #tpu.memory_space<vmem>>, %arg3: memref<8x8xf32, #tpu.memory_space<vmem>>, %arg4: memref<8x1xf32, #tpu.memory_space<vmem>>, %arg5: memref<1x8x256xf32, #tpu.memory_space<vmem>>, %arg6: memref<1x8x256xf32, #tpu.memory_space<vmem>>) attributes {dimension_semantics = [#tpu.dimension_semantics<parallel>, #tpu.dimension_semantics<parallel>], iteration_bounds = array<i64: 2, 1>, scalar_prefetch = 0 : i64, scratch_operands = 0 : i64, tpu.core_type = #tpu.core_type<tc>, window_params = [{transform_indices = @transform_0, window_bounds = array<i64: 1, 8, 256>}, {pipeline_mode = #tpu.pipeline_mode<synchronous>, transform_indices = @transform_1, window_bounds = array<i64: 8, 8>}, {pipeline_mode = #tpu.pipeline_mode<synchronous>, transform_indices = @transform_2, window_bounds = array<i64: 8, 1>}, {transform_indices = @transform_3, window_bounds = array<i64: 1, 8, 256>}, {transform_indices = @transform_4, window_bounds = array<i64: 1, 8, 256>}]} {
    %c0 = arith.constant 0 : index
    %c0_0 = arith.constant 0 : index
    %c0_1 = arith.constant 0 : index
    %0 = vector.load %arg2[%c0, %c0_0, %c0_1] : memref<1x8x256xf32, #tpu.memory_space<vmem>>, vector<1x8x256xf32>
    %1 = vector.shape_cast %0 : vector<1x8x256xf32> to vector<8x256xf32>
    %c0_2 = arith.constant 0 : index
    %c0_3 = arith.constant 0 : index
    %2 = vector.load %arg3[%c0_2, %c0_3] : memref<8x8xf32, #tpu.memory_space<vmem>>, vector<8x8xf32>
    %cst = arith.constant dense<0.000000e+00> : vector<8x256xf32>
    %3 = tpu.matmul %2, %1, %cst {dimension_numbers = #tpu.dot_dimension_numbers<[1], [0], [0], [1], [0, 0, 1, 1], [], []>} : vector<8x8xf32>, vector<8x256xf32>, vector<8x256xf32> -> vector<8x256xf32>
    %c0_4 = arith.constant 0 : index
    %c0_5 = arith.constant 0 : index
    %4 = vector.load %arg4[%c0_4, %c0_5] : memref<8x1xf32, #tpu.memory_space<vmem>>, vector<8x1xf32>
    %5 = vector.broadcast %4 : vector<8x1xf32> to vector<8x256xf32>
    %6 = arith.addf %3, %5 : vector<8x256xf32>
    %c0_6 = arith.constant 0 : index
    %c0_7 = arith.constant 0 : index
    %c0_8 = arith.constant 0 : index
    %7 = vector.load %arg5[%c0_6, %c0_7, %c0_8] : memref<1x8x256xf32, #tpu.memory_space<vmem>>, vector<1x8x256xf32>
    %8 = vector.shape_cast %7 : vector<1x8x256xf32> to vector<8x256xf32>
    %9 = arith.addf %8, %6 : vector<8x256xf32>
    %cst_9 = arith.constant 5.000000e-01 : f32
    %10 = vector.broadcast %cst_9 : f32 to vector<8x256xf32>
    %11 = arith.mulf %10, %9 : vector<8x256xf32>
    %cst_10 = arith.constant 0.707106769 : f32
    %12 = vector.broadcast %cst_10 : f32 to vector<8x256xf32>
    %13 = arith.mulf %9, %12 : vector<8x256xf32>
    %14 = math.erf %13 : vector<8x256xf32>
    %cst_11 = arith.constant 1.000000e+00 : f32
    %15 = vector.broadcast %cst_11 : f32 to vector<8x256xf32>
    %16 = arith.addf %15, %14 : vector<8x256xf32>
    %17 = arith.mulf %11, %16 : vector<8x256xf32>
    %c0_12 = arith.constant 0 : index
    %c0_13 = arith.constant 0 : index
    %c0_14 = arith.constant 0 : index
    %18 = vector.load %arg6[%c0_12, %c0_13, %c0_14] : memref<1x8x256xf32, #tpu.memory_space<vmem>>, vector<1x8x256xf32>
    %19 = vector.shape_cast %18 : vector<1x8x256xf32> to vector<8x256xf32>
    %20 = vector.shape_cast %17 : vector<8x256xf32> to vector<1x8x256xf32>
    tpu.vector_store %arg6[%c0_12, %c0_13, %c0_14], %20 {strides = array<i32>} : memref<1x8x256xf32, #tpu.memory_space<vmem>>, vector<1x8x256xf32>,
    return
  }
  func.func @transform_0(%arg0: i32, %arg1: i32) -> (i32, i32, i32) {
    %c0_i32 = arith.constant 0 : i32
    %c0_i32_0 = arith.constant 0 : i32
    return %arg0, %c0_i32, %arg1 : i32, i32, i32
  }
  func.func @transform_1(%arg0: i32, %arg1: i32) -> (i32, i32) {
    %c0_i32 = arith.constant 0 : i32
    %c0_i32_0 = arith.constant 0 : i32
    %c0_i32_1 = arith.constant 0 : i32
    return %c0_i32, %c0_i32_0 : i32, i32
  }
  func.func @transform_2(%arg0: i32, %arg1: i32) -> (i32, i32) {
    %c0_i32 = arith.constant 0 : i32
    %c0_i32_0 = arith.constant 0 : i32
    %c0_i32_1 = arith.constant 0 : i32
    return %c0_i32, %c0_i32_0 : i32, i32
  }
  func.func @transform_3(%arg0: i32, %arg1: i32) -> (i32, i32, i32) {
    %c0_i32 = arith.constant 0 : i32
    %c0_i32_0 = arith.constant 0 : i32
    return %arg0, %c0_i32, %arg1 : i32, i32, i32
  }
  func.func @transform_4(%arg0: i32, %arg1: i32) -> (i32, i32, i32) {
    %c0_i32 = arith.constant 0 : i32
    %c0_i32_0 = arith.constant 0 : i32
    return %arg0, %c0_i32, %arg1 : i32, i32, i32
  }
}

</mosaic_0001>

<bundles_post_ra>
// kernel: fno_layer_forward.2
= control target key start
LH: loop header
LB: loop body
LE: loop exit
PB: predicated region body
PF: predicated region fallthrough
CT: control target
= control target key end

     0   :  { %v39_v0 = vlaneseq  ;;  %vm295_vm0 = vcmask 261120   ;;  %s694_s0 = inlined_call_operand.vmem [shape: f32[2,8,32], index: 0, kind: input, shape index: {}]   ;;  %s695_s1 = inlined_call_operand.vmem [shape: f32[2,8,32], index: 1, kind: input, shape index: {}]   ;;  %s696_s2 = inlined_call_operand.vmem [shape: f32[8,8,32], index: 2, kind: input, shape index: {}]   ;;  %s697_s3 = inlined_call_operand.vmem [shape: f32[8,8,32], index: 3, kind: input, shape index: {}]   ;;  %s698_s4 = inlined_call_operand.vmem [shape: f32[2,8,32], index: 4, kind: output, shape index: {0}]   ;;  %s699_s5 = inlined_call_operand.vmem [shape: f32[2,8,32], index: 5, kind: output, shape index: {1}]  }
   0x1   :  { %v341_v2 = vld [vmem:[%s694_s0] sm:$0xff]  ;;  %v356_v8 = vld [vmem:[%s696_s2 + $0x8] sm:$0xff]  ;;  %v392_v20 = vld [vmem:[%s696_s2 + $0x10] sm:$0xff] }
   0x2   :  { %v40_v1 = vshrl.u32 %v39_v0, 7  ;;  %v346_v3 = vld [vmem:[%s695_s1] sm:$0xff]  ;;  %v387_v19 = vld [vmem:[%s694_s0 + $0x8] sm:$0xff]  ;;  %v423_v30 = vld [vmem:[%s696_s2 + $0x18] sm:$0xff] }
   0x3   :  { %v351_v7 = vld [vmem:[%s696_s2] sm:$0xff]  ;;  %v397_v21 = vld [vmem:[%s697_s3 + $0x8] sm:$0xff]  ;;  %v430_v33 = vld [vmem:[%s697_s3 + $0x10] sm:$0xff] }
   0x4   :  { %v41_v4 = vsub.s32 0, %v40_v1  ;;  %v73_v5 = vsub.s32 1, %v40_v1  ;;  %v105_v6 = vsub.s32 2, %v40_v1  ;;  %v361_v9 = vld [vmem:[%s697_s3] sm:$0xff]  ;;  %v137_v14 = vsub.s32 3, %v40_v1  ;;  %v415_v28 = vld [vmem:[%s695_s1 + $0x8] sm:$0xff] }
   0x5   :  { %v410_v27 = vsub.s32 4, %v40_v1  ;;  %v432_v34 = vsub.s32 5, %v40_v1  ;;  %v437_v35 = vld [vmem:[%s697_s3 + $0x18] sm:$0xff]  ;;  %v460_v44 = vld [vmem:[%s696_s2 + $0x20] sm:$0xff]  ;;  %v475_v50 = vsub.s32 6, %v40_v1  ;;  %v485_v53 = vld [vmem:[%s696_s2 + $0x28] sm:$0xff] }
   0x6   :  { %v364_v10 = vrot.slane %v341_v2, %v41_v4  ;;  %v367_v11 = vrot.slane %v346_v3, %v41_v4  ;;  %v370_v12 = vrot.slane %v341_v2, %v73_v5  ;;  %v373_v13 = vrot.slane %v346_v3, %v73_v5  ;;  %v503_v61 = vld [vmem:[%s697_s3 + $0x20] sm:$0xff] }
   0x7   :  { %v382_v18 = vrot.slane %v341_v2, %v105_v6  ;;  %v402_v24 = vrot.slane %v346_v3, %v105_v6  ;;  %v405_v25 = vrot.slane %v341_v2, %v137_v14  ;;  %v408_v26 = vrot.slane %v346_v3, %v137_v14 }
   0x8   :  { %v47_v15 = vmul.f32 %v364_v10, %v351_v7  ;;  %v59_v16 = vmul.f32 %v367_v11, %v361_v9  ;;  %v79_v17 = vmul.f32 %v370_v12, %v356_v8  ;;  %v91_v23 = vmul.f32 %v373_v13, %v397_v21 }
   0x9   :  { %v418_v29 = vrot.slane %v387_v19, %v41_v4  ;;  %v111_v32 = vmul.f32 %v382_v18, %v392_v20  ;;  %v123_v37 = vmul.f32 %v402_v24, %v430_v33  ;;  %v444_v39 = vrot.slane %v415_v28, %v41_v4 }
   0xa   :  { %v61_v22 = vsub.f32 %v47_v15, %v59_v16  ;;  %v143_v40 = vmul.f32 %v405_v25, %v423_v30  ;;  %v155_v41 = vmul.f32 %v408_v26, %v437_v35  ;;  %v452_v42 = vrot.slane %v341_v2, %v410_v27  ;;  %v521_v15 = vld [vmem:[%s696_s2 + $0x30] sm:$0xff]  ;;  %v526_v16 = vld [vmem:[%s697_s3 + $0x28] sm:$0xff] }
   0xb   :  { %v48_v38 = vmul.f32 %v418_v29, %v351_v7  ;;  %v455_v43 = vrot.slane %v387_v19, %v73_v5  ;;  %v464_v46 = vrot.slane %v346_v3, %v410_v27  ;;  %v60_v47 = vmul.f32 %v444_v39, %v361_v9 }
   0xc   :  { %v81_v31 = vadd.f32 %v79_v17, %v61_v22  ;;  %v469_v48 = vrot.slane %v415_v28, %v73_v5  ;;  %v473_v49 = vrot.slane %v341_v2, %v432_v34  ;;  %v480_v52 = vrot.slane %v387_v19, %v105_v6 }
   0xd   :  { %v80_v51 = vmul.f32 %v455_v43, %v356_v8  ;;  %v62_v55 = vsub.f32 %v48_v38, %v60_v47  ;;  %v490_v57 = vrot.slane %v415_v28, %v105_v6  ;;  %v175_v58 = vmul.f32 %v452_v42, %v460_v44  ;;  %v556_v47 = vld [vmem:[%s696_s2 + $0x38] sm:$0xff] }
   0xe   :  { %v93_v36 = vsub.f32 %v81_v31, %v91_v23  ;;  %v92_v56 = vmul.f32 %v469_v48, %v397_v21  ;;  %v496_v59 = vrot.slane %v346_v3, %v432_v34  ;;  %v498_v60 = vsub.s32 7, %v40_v1 }
   0xf   :  { %v82_v63 = vadd.f32 %v80_v51, %v62_v55  ;;  %v112_v0 = vmul.f32 %v480_v52, %v392_v20  ;;  %v508_v4 = vrot.slane %v387_v19, %v137_v14  ;;  %v187_v5 = vmul.f32 %v464_v46, %v503_v61  ;;  %v569_v55 = vld [vmem:[%s697_s3 + $0x30] sm:$0xff] }
  0x10   :  { %v113_v45 = vadd.f32 %v111_v32, %v93_v36  ;;  %v207_v1 = vmul.f32 %v473_v49, %v485_v53  ;;  %v516_v6 = vrot.slane %v341_v2, %v475_v50  ;;  %v124_v23 = vmul.f32 %v490_v57, %v430_v33 }
  0x11   :  { %v94_v22 = vsub.f32 %v82_v63, %v92_v56  ;;  %v531_v31 = vrot.slane %v415_v28, %v137_v14  ;;  %v219_v32 = vmul.f32 %v496_v59, %v526_v16  ;;  %v537_v36 = vrot.slane %v346_v3, %v475_v50 }
  0x12   :  { %v125_v54 = vsub.f32 %v113_v45, %v123_v37  ;;  %v541_v37 = vrot.slane %v341_v2, %v498_v60  ;;  %v545_v38 = vrot.slane %v346_v3, %v498_v60  ;;  %v144_v14 = vmul.f32 %v508_v4, %v423_v30 }
  0x13   :  { %v551_v45 = vrot.slane %v387_v19, %v410_v27  ;;  %v239_v2 = vmul.f32 %v516_v6, %v521_v15  ;;  %v63_v3 = vmul.f32 %v364_v10, %v361_v9  ;;  %v67_v51 = vmul.f32 %v367_v11, %v351_v7 }
  0x14   :  { %v145_v62 = vadd.f32 %v143_v40, %v125_v54  ;;  %701 = vst [vmem:[#allocation2_spill] sm:$0xff] %v545_v38  ;;  %v95_v54 = vmul.f32 %v370_v12, %v397_v21  ;;  %v575_v63 = vrot.slane %v415_v28, %v410_v27  ;;  %v251_v10 = vmul.f32 %v537_v36, %v569_v55 }
  0x15   :  { %v581_v11 = vrot.slane %v387_v19, %v432_v34  ;;  %v69_v12 = vadd.f32 %v67_v51, %v63_v3  ;;  %v271_v27 = vmul.f32 %v541_v37, %v556_v47  ;;  %v127_v3 = vmul.f32 %v382_v18, %v430_v33 }
  0x16   :  { %v157_v17 = vsub.f32 %v145_v62, %v155_v41  ;;  %v114_v41 = vadd.f32 %v112_v0, %v94_v22  ;;  %v156_v62 = vmul.f32 %v531_v31, %v437_v35  ;;  %v99_v0 = vmul.f32 %v373_v13, %v356_v8 }
  0x17   :  { %v598_v13 = vrot.slane %v415_v28, %v432_v34  ;;  %v131_v34 = vmul.f32 %v402_v24, %v392_v20  ;;  %v159_v24 = vmul.f32 %v405_v25, %v437_v35  ;;  %v128_v25 = vmul.f32 %v480_v52, %v430_v33 }
  0x18   :  { %v177_v40 = vadd.f32 %v175_v58, %v157_v17  ;;  %v126_v58 = vsub.f32 %v114_v41, %v124_v23  ;;  %v176_v23 = vmul.f32 %v551_v45, %v460_v44  ;;  %v97_v41 = vadd.f32 %v95_v54, %v69_v12 }
  0x19   :  { %v64_v54 = vmul.f32 %v418_v29, %v361_v9  ;;  %v96_v12 = vmul.f32 %v455_v43, %v397_v21  ;;  %v195_v33 = vmul.f32 %v464_v46, %v460_v44 }
  0x1a   :  { %v189_v56 = vsub.f32 %v177_v40, %v187_v5  ;;  %v588_v5 = vld [vmem:[%s697_s3 + $0x38] sm:$0xff]  ;;  %v146_v22 = vadd.f32 %v144_v14, %v126_v58  ;;  %v188_v14 = vmul.f32 %v575_v63, %v503_v61  ;;  %v208_v58 = vmul.f32 %v581_v11, %v485_v53 }
  0x1b   :  { %v283_v40 = vmul.f32 %v545_v38, %v588_v5  ;;  %v101_v38 = vadd.f32 %v99_v0, %v97_v41  ;;  %v622_v0 = vrot.slane %v415_v28, %v475_v50 }
  0x1c   :  { %v209_v17 = vadd.f32 %v207_v1, %v189_v56  ;;  %v158_v51 = vsub.f32 %v146_v22, %v156_v62  ;;  %v606_v56 = vrot.slane %v387_v19, %v475_v50  ;;  %v68_v62 = vmul.f32 %v444_v39, %v351_v7 }
  0x1d   :  { %v129_v22 = vadd.f32 %v127_v3, %v101_v38  ;;  %v100_v7 = vmul.f32 %v469_v48, %v356_v8  ;;  %v270_v39 = vrot.slane %v387_v19, %v498_v60  ;;  %v163_v50 = vmul.f32 %v408_v26, %v423_v30 }
  0x1e   :  { %v221_v1 = vsub.f32 %v209_v17, %v219_v32  ;;  %v178_v32 = vadd.f32 %v176_v23, %v158_v51  ;;  %v220_v17 = vmul.f32 %v598_v13, %v526_v16  ;;  %v240_v21 = vmul.f32 %v606_v56, %v521_v15 }
  0x1f   :  { %v133_v43 = vadd.f32 %v131_v34, %v129_v22  ;;  %v282_v8 = vrot.slane %v415_v28, %v498_v60  ;;  %v191_v19 = vmul.f32 %v452_v42, %v503_v61  ;;  %v132_v26 = vmul.f32 %v490_v57, %v392_v20 }
  0x20   :  { %v241_v18 = vadd.f32 %v239_v2, %v221_v1  ;;  %v190_v29 = vsub.f32 %v178_v32, %v188_v14  ;;  %v70_v2 = vadd.f32 %v68_v62, %v64_v54  ;;  %v272_v52 = vmul.f32 %v270_v39, %v556_v47 }
  0x21   :  { %v161_v48 = vadd.f32 %v159_v24, %v133_v43  ;;  %v160_v42 = vmul.f32 %v508_v4, %v437_v35  ;;  %v223_v20 = vmul.f32 %v473_v49, %v526_v16  ;;  %v284_v14 = vmul.f32 %v282_v8, %v588_v5 }
  0x22   :  { %v253_v9 = vsub.f32 %v241_v18, %v251_v10  ;;  %v210_v23 = vadd.f32 %v208_v58, %v190_v29  ;;  %v98_v41 = vadd.f32 %v96_v12, %v70_v2  ;;  %v252_v10 = vmul.f32 %v622_v0, %v569_v55 }
  0x23   :  { %v164_v58 = vmul.f32 %v531_v31, %v423_v30  ;;  %v227_v54 = vmul.f32 %v496_v59, %v485_v53  ;;  %v192_v35 = vmul.f32 %v551_v45, %v503_v61  ;;  %v255_v49 = vmul.f32 %v516_v6, %v569_v55 }
  0x24   :  { %v273_v38 = vadd.f32 %v271_v27, %v253_v9  ;;  %v222_v1 = vsub.f32 %v210_v23, %v220_v17  ;;  %v102_v51 = vadd.f32 %v100_v7, %v98_v41  ;;  %v165_v27 = vadd.f32 %v163_v50, %v161_v48 }
  0x25   :  { %v196_v17 = vmul.f32 %v575_v63, %v460_v44  ;;  %v259_v30 = vmul.f32 %v537_v36, %v521_v15  ;;  %v224_v61 = vmul.f32 %v581_v11, %v526_v16  ;;  %v287_v6 = vmul.f32 %v541_v37, %v588_v5  ;;  %v702_v36 = vld [vmem:[#allocation2_spill] sm:$0xff] }
  0x26   :  { %v285_v3 = vsub.f32 %v273_v38, %v283_v40  ;;  %v242_v28 = vadd.f32 %v240_v21, %v222_v1  ;;  %v130_v60 = vadd.f32 %v128_v25, %v102_v51  ;;  %v193_v40 = vadd.f32 %v191_v19, %v165_v27 }
  0x27   :  { %v228_v44 = vmul.f32 %v598_v13, %v485_v53  ;;  %v291_v24 = vmul.f32 %v702_v36, %v556_v47  ;;  %v256_v29 = vmul.f32 %v606_v56, %v569_v55  ;;  %v260_v16 = vmul.f32 %v622_v0, %v521_v15 }
  0x28   :  { %296 = vst.msk [vmem:[%s698_s4] sm:$0xff] %vm295_vm0, %v285_v3  ;;  %v254_v57 = vsub.f32 %v242_v28, %v252_v10  ;;  %v134_v46 = vadd.f32 %v132_v26, %v130_v60  ;;  %v197_v34 = vadd.f32 %v195_v33, %v193_v40  ;;  %v288_v37 = vmul.f32 %v270_v39, %v588_v5 }
  0x29   :  { %v292_v13 = vmul.f32 %v282_v8, %v556_v47 }
  0x2a   :  { %v274_v18 = vadd.f32 %v272_v52, %v254_v57  ;;  %v162_v32 = vadd.f32 %v160_v42, %v134_v46  ;;  %v225_v4 = vadd.f32 %v223_v20, %v197_v34 }
  0x2c   :  { %v286_v62 = vsub.f32 %v274_v18, %v284_v14  ;;  %v166_v12 = vadd.f32 %v164_v58, %v162_v32  ;;  %v229_v22 = vadd.f32 %v227_v54, %v225_v4 }
  0x2e   :  { %297 = vst.msk [vmem:[%s698_s4 + $0x8] sm:$0xff] %vm295_vm0, %v286_v62  ;;  %v194_v59 = vadd.f32 %v192_v35, %v166_v12  ;;  %v257_v31 = vadd.f32 %v255_v49, %v229_v22 }
  0x30   :  { %v198_v45 = vadd.f32 %v196_v17, %v194_v59  ;;  %v261_v63 = vadd.f32 %v259_v30, %v257_v31 }
  0x32   :  { %v226_v9 = vadd.f32 %v224_v61, %v198_v45  ;;  %v289_v2 = vadd.f32 %v287_v6, %v261_v63 }
  0x34   :  { %v230_v7 = vadd.f32 %v228_v44, %v226_v9  ;;  %v293_v11 = vadd.f32 %v291_v24, %v289_v2 }
  0x36   :  { %v258_v21 = vadd.f32 %v256_v29, %v230_v7  ;;  %298 = vst.msk [vmem:[%s699_s5] sm:$0xff] %vm295_vm0, %v293_v11 }
  0x38   :  { %v262_v53 = vadd.f32 %v260_v16, %v258_v21 }
  0x3a   :  { %v290_v43 = vadd.f32 %v288_v37, %v262_v53 }
  0x3c   :  { %v294_v50 = vadd.f32 %v292_v13, %v290_v43 }
  0x3e   :  { %299 = vst.msk [vmem:[%s699_s5 + $0x8] sm:$0xff] %vm295_vm0, %v294_v50 }

// kernel: reverse.0
= control target key start
LH: loop header
LB: loop body
LE: loop exit
PB: predicated region body
PF: predicated region fallthrough
CT: control target
= control target key end

     0   :  { %v103_v3 = vlaneseq  ;;  %v96_v18 = vld [vmem:[#allocation0 + $0x7] ss:$-1 sm:$0xff]  ;;  %v110_v19 = vld [vmem:[#allocation0 + $0x17] ss:$-1 sm:$0xff]  ;;  %s604_s0 = inlined_call_operand.vmem [shape: f32[2,8,16,7], index: 0, kind: input, shape index: {}]   ;;  %s605_s1 = inlined_call_operand.vmem [shape: f32[2,8,16,7], index: 1, kind: output, shape index: {}]  }
   0x1   :  { %v60_v0 = vld [vmem:[%s604_s0] sm:$0xff]  ;;  %v62_v1 = vld [vmem:[%s604_s0 + $0x8] sm:$0xff]  ;;  %v64_v2 = vld [vmem:[%s604_s0 + $0x10] sm:$0xff]  ;;  %v97_v20 = vrot.slane %v96_v18, 1  ;;  %v111_v21 = vrot.slane %v110_v19, 1 }
   0x2   :  { %61 = vst [vmem:[#allocation0 + $0x8] sm:$0xff] %v60_v0  ;;  %63 = vst [vmem:[#allocation0 + $0x18] sm:$0xff] %v62_v1  ;;  %v66_v4 = vld [vmem:[%s604_s0 + $0x18] sm:$0xff]  ;;  %v68_v5 = vld [vmem:[%s604_s0 + $0x20] sm:$0xff]  ;;  %v500_v10 = vshrl.u32 %v103_v3, 7 }
   0x3   :  { %65 = vst [vmem:[#allocation0 + $0x28] sm:$0xff] %v64_v2  ;;  %v70_v6 = vld [vmem:[%s604_s0 + $0x28] sm:$0xff]  ;;  %67 = vst [vmem:[#allocation0 + $0x38] sm:$0xff] %v66_v4  ;;  %v72_v7 = vld [vmem:[%s604_s0 + $0x30] sm:$0xff] }
   0x4   :  { %69 = vst [vmem:[#allocation0 + $0x48] sm:$0xff] %v68_v5  ;;  %71 = vst [vmem:[#allocation0 + $0x58] sm:$0xff] %v70_v6  ;;  %v74_v8 = vld [vmem:[%s604_s0 + $0x38] sm:$0xff]  ;;  %v76_v9 = vld [vmem:[%s604_s0 + $0x40] sm:$0xff]  ;;  %vm105_vm0 = vcmp.lt.s32.totalorder %v500_v10, 7 }
   0x5   :  { %73 = vst [vmem:[#allocation0 + $0x68] sm:$0xff] %v72_v7  ;;  %75 = vst [vmem:[#allocation0 + $0x78] sm:$0xff] %v74_v8  ;;  %v78_v11 = vld [vmem:[%s604_s0 + $0x48] sm:$0xff]  ;;  %v80_v12 = vld [vmem:[%s604_s0 + $0x50] sm:$0xff] }
   0x6   :  { %77 = vst [vmem:[#allocation0 + $0x88] sm:$0xff] %v76_v9  ;;  %v82_v13 = vld [vmem:[%s604_s0 + $0x58] sm:$0xff]  ;;  %79 = vst [vmem:[#allocation0 + $0x98] sm:$0xff] %v78_v11  ;;  %v84_v14 = vld [vmem:[%s604_s0 + $0x60] sm:$0xff] }
   0x7   :  { %81 = vst [vmem:[#allocation0 + $0xa8] sm:$0xff] %v80_v12  ;;  %83 = vst [vmem:[#allocation0 + $0xb8] sm:$0xff] %v82_v13  ;;  %v86_v15 = vld [vmem:[%s604_s0 + $0x68] sm:$0xff]  ;;  %v88_v16 = vld [vmem:[%s604_s0 + $0x70] sm:$0xff] }
   0x8   :  { %85 = vst [vmem:[#allocation0 + $0xc8] sm:$0xff] %v84_v14  ;;  %87 = vst [vmem:[#allocation0 + $0xd8] sm:$0xff] %v86_v15  ;;  %v90_v17 = vld [vmem:[%s604_s0 + $0x78] sm:$0xff]  ;;  %v124_v22 = vld [vmem:[#allocation0 + $0x27] ss:$-1 sm:$0xff] }
   0x9   :  { %89 = vst [vmem:[#allocation0 + $0xe8] sm:$0xff] %v88_v16  ;;  %91 = vst [vmem:[#allocation0 + $0xf8] sm:$0xff] %v90_v17  ;;  %v138_v23 = vld [vmem:[#allocation0 + $0x37] ss:$-1 sm:$0xff]  ;;  %v125_v24 = vrot.slane %v124_v22, 1 }
   0xa   :  { %v139_v25 = vrot.slane %v138_v23, 1  ;;  %v152_v26 = vld [vmem:[#allocation0 + $0x47] ss:$-1 sm:$0xff]  ;;  %v166_v27 = vld [vmem:[#allocation0 + $0x57] ss:$-1 sm:$0xff]  ;;  %98 = vst [vmem:[#allocation1] sm:$0xff] %v97_v20 }
   0xb   :  { %v101_v28 = vld [vmem:[#allocation0 + $0xf] ss:$-1 sm:$0xff]  ;;  %112 = vst [vmem:[#allocation1 + $0x8] sm:$0xff] %v111_v21  ;;  %v115_v29 = vld [vmem:[#allocation0 + $0x1f] ss:$-1 sm:$0xff]  ;;  %126 = vst [vmem:[#allocation1 + $0x10] sm:$0xff] %v125_v24 }
   0xc   :  { %v129_v30 = vld [vmem:[#allocation0 + $0x2f] ss:$-1 sm:$0xff]  ;;  %v102_v31 = vrot.slane %v101_v28, 1  ;;  %v116_v32 = vrot.slane %v115_v29, 1  ;;  %140 = vst [vmem:[#allocation1 + $0x18] sm:$0xff] %v139_v25  ;;  %v153_v35 = vrot.slane %v152_v26, 1 }
   0xd   :  { %v130_v33 = vrot.slane %v129_v30, 1  ;;  %v143_v34 = vld [vmem:[#allocation0 + $0x3f] ss:$-1 sm:$0xff]  ;;  %v157_v37 = vld [vmem:[#allocation0 + $0x4f] ss:$-1 sm:$0xff]  ;;  %v167_v38 = vrot.slane %v166_v27, 1 }
   0xe   :  { %v144_v36 = vrot.slane %v143_v34, 1  ;;  %v171_v39 = vld [vmem:[#allocation0 + $0x5f] ss:$-1 sm:$0xff]  ;;  %106 = vst.msk [vmem:[#allocation1] sm:$0xff] %vm105_vm0, %v102_v31  ;;  %120 = vst.msk [vmem:[#allocation1 + $0x8] sm:$0xff] %vm105_vm0, %v116_v32  ;;  %v158_v40 = vrot.slane %v157_v37, 1 }
   0xf   :  { %134 = vst.msk [vmem:[#allocation1 + $0x10] sm:$0xff] %vm105_vm0, %v130_v33  ;;  %154 = vst [vmem:[#allocation1 + $0x20] sm:$0xff] %v153_v35  ;;  %v172_v41 = vrot.slane %v171_v39, 1  ;;  %v180_v42 = vld [vmem:[#allocation0 + $0x67] ss:$-1 sm:$0xff] }
  0x10   :  { %v185_v43 = vld [vmem:[#allocation0 + $0x6f] ss:$-1 sm:$0xff]  ;;  %148 = vst.msk [vmem:[#allocation1 + $0x18] sm:$0xff] %vm105_vm0, %v144_v36  ;;  %168 = vst [vmem:[#allocation1 + $0x28] sm:$0xff] %v167_v38  ;;  %v181_v44 = vrot.slane %v180_v42, 1 }
  0x11   :  { %v186_v45 = vrot.slane %v185_v43, 1  ;;  %v194_v46 = vld [vmem:[#allocation0 + $0x77] ss:$-1 sm:$0xff]  ;;  %v199_v47 = vld [vmem:[#allocation0 + $0x7f] ss:$-1 sm:$0xff]  ;;  %162 = vst.msk [vmem:[#allocation1 + $0x20] sm:$0xff] %vm105_vm0, %v158_v40 }
  0x12   :  { %176 = vst.msk [vmem:[#allocation1 + $0x28] sm:$0xff] %vm105_vm0, %v172_v41  ;;  %v195_v48 = vrot.slane %v194_v46, 1  ;;  %v200_v49 = vrot.slane %v199_v47, 1  ;;  %v208_v50 = vld [vmem:[#allocation0 + $0x87] ss:$-1 sm:$0xff]  ;;  %182 = vst [vmem:[#allocation1 + $0x30] sm:$0xff] %v181_v44 }
  0x13   :  { %v213_v51 = vld [vmem:[#allocation0 + $0x8f] ss:$-1 sm:$0xff]  ;;  %v209_v52 = vrot.slane %v208_v50, 1  ;;  %v222_v54 = vld [vmem:[#allocation0 + $0x97] ss:$-1 sm:$0xff]  ;;  %190 = vst.msk [vmem:[#allocation1 + $0x30] sm:$0xff] %vm105_vm0, %v186_v45 }
  0x14   :  { %v214_v53 = vrot.slane %v213_v51, 1  ;;  %v227_v55 = vld [vmem:[#allocation0 + $0x9f] ss:$-1 sm:$0xff]  ;;  %196 = vst [vmem:[#allocation1 + $0x38] sm:$0xff] %v195_v48  ;;  %v223_v56 = vrot.slane %v222_v54, 1 }
  0x15   :  { %v228_v57 = vrot.slane %v227_v55, 1  ;;  %v236_v58 = vld [vmem:[#allocation0 + $0xa7] ss:$-1 sm:$0xff]  ;;  %v241_v59 = vld [vmem:[#allocation0 + $0xaf] ss:$-1 sm:$0xff]  ;;  %204 = vst.msk [vmem:[#allocation1 + $0x38] sm:$0xff] %vm105_vm0, %v200_v49 }
  0x16   :  { %210 = vst [vmem:[#allocation1 + $0x40] sm:$0xff] %v209_v52  ;;  %v237_v60 = vrot.slane %v236_v58, 1  ;;  %v242_v61 = vrot.slane %v241_v59, 1  ;;  %v250_v62 = vld [vmem:[#allocation0 + $0xb7] ss:$-1 sm:$0xff]  ;;  %224 = vst [vmem:[#allocation1 + $0x48] sm:$0xff] %v223_v56 }
  0x17   :  { %v255_v63 = vld [vmem:[#allocation0 + $0xbf] ss:$-1 sm:$0xff]  ;;  %218 = vst.msk [vmem:[#allocation1 + $0x40] sm:$0xff] %vm105_vm0, %v214_v53  ;;  %v251_v0 = vrot.slane %v250_v62, 1  ;;  %v264_v2 = vld [vmem:[#allocation0 + $0xc7] ss:$-1 sm:$0xff] }
  0x18   :  { %v256_v1 = vrot.slane %v255_v63, 1  ;;  %v269_v3 = vld [vmem:[#allocation0 + $0xcf] ss:$-1 sm:$0xff]  ;;  %232 = vst.msk [vmem:[#allocation1 + $0x48] sm:$0xff] %vm105_vm0, %v228_v57  ;;  %238 = vst [vmem:[#allocation1 + $0x50] sm:$0xff] %v237_v60  ;;  %v265_v4 = vrot.slane %v264_v2, 1 }
  0x19   :  { %v270_v5 = vrot.slane %v269_v3, 1  ;;  %v278_v6 = vld [vmem:[#allocation0 + $0xd7] ss:$-1 sm:$0xff]  ;;  %v283_v7 = vld [vmem:[#allocation0 + $0xdf] ss:$-1 sm:$0xff]  ;;  %246 = vst.msk [vmem:[#allocation1 + $0x50] sm:$0xff] %vm105_vm0, %v242_v61 }
  0x1a   :  { %252 = vst [vmem:[#allocation1 + $0x58] sm:$0xff] %v251_v0  ;;  %v279_v8 = vrot.slane %v278_v6, 1  ;;  %v284_v9 = vrot.slane %v283_v7, 1  ;;  %v292_v11 = vld [vmem:[#allocation0 + $0xe7] ss:$-1 sm:$0xff]  ;;  %266 = vst [vmem:[#allocation1 + $0x60] sm:$0xff] %v265_v4 }
  0x1b   :  { %v297_v12 = vld [vmem:[#allocation0 + $0xef] ss:$-1 sm:$0xff]  ;;  %260 = vst.msk [vmem:[#allocation1 + $0x58] sm:$0xff] %vm105_vm0, %v256_v1  ;;  %v293_v13 = vrot.slane %v292_v11, 1  ;;  %v306_v15 = vld [vmem:[#allocation0 + $0xf7] ss:$-1 sm:$0xff] }
  0x1c   :  { %v298_v14 = vrot.slane %v297_v12, 1  ;;  %v311_v16 = vld [vmem:[#allocation0 + $0xff] ss:$-1 sm:$0xff]  ;;  %274 = vst.msk [vmem:[#allocation1 + $0x60] sm:$0xff] %vm105_vm0, %v270_v5  ;;  %280 = vst [vmem:[#allocation1 + $0x68] sm:$0xff] %v279_v8  ;;  %v307_v17 = vrot.slane %v306_v15, 1 }
  0x1d   :  { %v312_v18 = vrot.slane %v311_v16, 1  ;;  %v374_v19 = vld [vmem:[#allocation1] sm:$0xff]  ;;  %v376_v20 = vld [vmem:[#allocation1 + $0x8] sm:$0xff]  ;;  %v378_v21 = vld [vmem:[#allocation1 + $0x10] sm:$0xff]  ;;  %288 = vst.msk [vmem:[#allocation1 + $0x68] sm:$0xff] %vm105_vm0, %v284_v9 }
  0x1e   :  { %294 = vst [vmem:[#allocation1 + $0x70] sm:$0xff] %v293_v13  ;;  %375 = vst [vmem:[%s605_s1] sm:$0xff] %v374_v19  ;;  %v380_v22 = vld [vmem:[#allocation1 + $0x18] sm:$0xff]  ;;  %v382_v23 = vld [vmem:[#allocation1 + $0x20] sm:$0xff] }
  0x1f   :  { %377 = vst [vmem:[%s605_s1 + $0x8] sm:$0xff] %v376_v20  ;;  %379 = vst [vmem:[%s605_s1 + $0x10] sm:$0xff] %v378_v21  ;;  %v384_v24 = vld [vmem:[#allocation1 + $0x28] sm:$0xff]  ;;  %v386_v25 = vld [vmem:[#allocation1 + $0x30] sm:$0xff] }
  0x20   :  { %302 = vst.msk [vmem:[#allocation1 + $0x70] sm:$0xff] %vm105_vm0, %v298_v14  ;;  %308 = vst [vmem:[#allocation1 + $0x78] sm:$0xff] %v307_v17  ;;  %v388_v26 = vld [vmem:[#allocation1 + $0x38] sm:$0xff]  ;;  %v390_v10 = vld [vmem:[#allocation1 + $0x40] sm:$0xff] }
  0x21   :  { %381 = vst [vmem:[%s605_s1 + $0x18] sm:$0xff] %v380_v22  ;;  %383 = vst [vmem:[%s605_s1 + $0x20] sm:$0xff] %v382_v23  ;;  %v392_v27 = vld [vmem:[#allocation1 + $0x48] sm:$0xff]  ;;  %v394_v28 = vld [vmem:[#allocation1 + $0x50] sm:$0xff] }
  0x22   :  { %385 = vst [vmem:[%s605_s1 + $0x28] sm:$0xff] %v384_v24  ;;  %316 = vst.msk [vmem:[#allocation1 + $0x78] sm:$0xff] %vm105_vm0, %v312_v18  ;;  %v396_v29 = vld [vmem:[#allocation1 + $0x58] sm:$0xff] }
  0x23   :  { %387 = vst [vmem:[%s605_s1 + $0x30] sm:$0xff] %v386_v25  ;;  %389 = vst [vmem:[%s605_s1 + $0x38] sm:$0xff] %v388_v26  ;;  %v398_v30 = vld [vmem:[#allocation1 + $0x60] sm:$0xff] }
  0x24   :  { %391 = vst [vmem:[%s605_s1 + $0x40] sm:$0xff] %v390_v10  ;;  %393 = vst [vmem:[%s605_s1 + $0x48] sm:$0xff] %v392_v27  ;;  %v400_v31 = vld [vmem:[#allocation1 + $0x68] sm:$0xff] }
  0x25   :  { %395 = vst [vmem:[%s605_s1 + $0x50] sm:$0xff] %v394_v28  ;;  %397 = vst [vmem:[%s605_s1 + $0x58] sm:$0xff] %v396_v29 }
  0x26   :  { %399 = vst [vmem:[%s605_s1 + $0x60] sm:$0xff] %v398_v30  ;;  %401 = vst [vmem:[%s605_s1 + $0x68] sm:$0xff] %v400_v31 }
  0x27   :  { %v402_v32 = vld [vmem:[#allocation1 + $0x70] sm:$0xff] }
  0x28   :  { %403 = vst [vmem:[%s605_s1 + $0x70] sm:$0xff] %v402_v32 }
  0x29   :  { %v404_v33 = vld [vmem:[#allocation1 + $0x78] sm:$0xff] }
  0x2a   :  { %405 = vst [vmem:[%s605_s1 + $0x78] sm:$0xff] %v404_v33 }

// kernel: fno_layer_forward.3
= control target key start
LH: loop header
LB: loop body
LE: loop exit
PB: predicated region body
PF: predicated region fallthrough
CT: control target
= control target key end

     0   :  { %s577_s15 = smov 0   ;;  %s579_s16 = smov 0   ;;  %s619_s0 = inlined_call_operand.vmem [shape: f32[2,8,256], index: 0, kind: input, shape index: {}]   ;;  %s620_s1 = inlined_call_operand.vmem [shape: f32[8,8], index: 1, kind: input, shape index: {}]   ;;  %s621_s2 = inlined_call_operand.vmem [shape: f32[8,1], index: 2, kind: input, shape index: {}]   ;;  %s622_s3 = inlined_call_operand.vmem [shape: f32[2,8,256], index: 3, kind: input, shape index: {}, may-alias: {3,4}]   ;;  %s623_s4 = inlined_call_operand.vmem [shape: f32[2,8,256], index: 4, kind: output, shape index: {}, may-alias: {3,4}]  }
   0x1   :  { %s581_s17 = smov 0  }
   0x2 LB: > { %s26_s18 = sadd.s32 1, %s544_s16  ;;  %p482_p0 = scmp.ge.s32.totalorder %s548_s17, 1  ;;  %s548_s17 = sphi %s581_s17, %s14_s17   ;;  %s544_s16 = sphi %s579_s16, %s625_s16   ;;  %s540_s15 = sphi %s577_s15, %s624_s15  }
   0x3   : > { %p28_p1 = scmp.ge.s32.totalorder %s26_s18, 2  ;;  %p200_p2 = scmp.lt.s32.totalorder %s548_s17, 3 }
   0x5   : > { %s627_s18 = smov (%p28_p1, %s26_s18), 0  ;;  %p201_p3 = pnand %p482_p0, %p200_p2 }
   0x6   : > { %p244_p4 = scmp.lt.s32.totalorder (!%p201_p3), %s540_s15, 1  ;;  %v276_v0 = vld [vmem:[%s621_s2] sm:$0xff] (!%p201_p3)  ;;  %v550_v1 = vmov (!%p201_p3), 0.0   ;;  %v551_v2 = vmov (!%p201_p3), 0   ;;  %vm282_vm0 = vcmask (!%p201_p3), 64512  }
   0x7   : > { %204 = sbr.rel (%p201_p3) target bundleno = 255 (0xff), region = 36  ;;  %350 = vmatprep.mubr.f32.mxu0 (!%p201_p3), %v550_v1  ;;  %521 = vset.pattern.permute.xlu0 (!%p201_p3), %v551_v2  ;;  %v275_v5 = vld [vmem:[%s620_s1] sm:$0xff] (!%p201_p3) }
   0x8   : > { %279 = vperm.xlu0 (!%p201_p3), %521, %v276_v0  }
   0xe   : > { %s629_s15 = smov (!%p244_p4, %s540_s15), 1 }
   0xf   : > { %s492_s21 = sshll.u32 %s629_s15, 4 }
  0x10   : > { %s251_s24 = scalar_lea.vmem %s619_s0, %s492_s21  ;;  %s261_s29 = scalar_lea.vmem %s622_s3, %s492_s21 }
  0x11   : > { %v274_v3 = vld [vmem:[%s251_s24 + $0x8] sm:$0xff]  ;;  %v273_v4 = vld [vmem:[%s251_s24] sm:$0xff]  ;;  %s271_s6 = scalar_lea.vmem %s623_s4, %s492_s21 }
  0x12   : > { %286 = vmatprep.subr.mxu0 %v274_v3  ;;  %v357_v8 = vld [vmem:[%s261_s29] sm:$0xff]  ;;  %v358_v11 = vld [vmem:[%s261_s29 + $0x8] sm:$0xff] }
  0x13   : > { %287 = vmatpush1.msra.mxu0 %v273_v4 }
  0x14   : > { %489 = vmatmul.mubr.msk.f32.vlgmr.msra.gmra.mrb[0].mxu0 %vm282_vm0, %v275_v5 }
  0x87   : > { %v280_v6 = vpop.permute.xlu0 %279 }
  0xe7   : > { %v352_v7 = vpop.f32.mrb[0].mxu0 }
  0xe8   : > { %v353_v9 = vadd.f32 %v352_v7, %v280_v6  ;;  %v354_v10 = vpop.f32.mrb[1].mxu0 }
  0xe9   : > { %v355_v12 = vadd.f32 %v354_v10, %v280_v6 }
  0xea   : > { %v359_v13 = vadd.f32 %v357_v8, %v353_v9 }
  0xeb   : > { %v360_v14 = vadd.f32 %v358_v11, %v355_v12 }
  0xec   : > { %v363_v15 = vmul.f32 0.70710677, %v359_v13  ;;  %v361_v19 = vmul.f32 0.5, %v359_v13 }
  0xed   : > { %v364_v16 = vmul.f32 0.70710677, %v360_v14  ;;  %v362_v21 = vmul.f32 0.5, %v360_v14 }
  0xee   : > { %522 = verf.f32 %v363_v15 }
  0xef   : > { %524 = verf.f32 %v364_v16 }
  0xf8   : > { %v523_v17 = vpop.eup %522 }
  0xf9   : > { %v525_v18 = vpop.eup %524  ;;  %v367_v20 = vadd.f32 1.0, %v523_v17 }
  0xfa   : > { %v368_v22 = vadd.f32 1.0, %v525_v18 }
  0xfb   : > { %v369_v23 = vmul.f32 %v367_v20, %v361_v19 }
  0xfc   : > { %v370_v24 = vmul.f32 %v368_v22, %v362_v21 }
  0xfd   : > { %371 = vst [vmem:[%s271_s6] sm:$0xff] %v369_v23 }
  0xfe   : > { %372 = vst [vmem:[%s271_s6 + $0x8] sm:$0xff] %v370_v24 }
  0xff PF: > { %s14_s17 = sadd.s32 1, %s548_s17   ;;  %s624_s15 = smov %s544_s16 }
 0x100   : > { %p11_p5 = scmp.ge.s32.totalorder %s14_s17, 4   ;;  %s625_s16 = smov %s627_s18 }
 0x102   :  { %13 = sbr.rel (!%p11_p5) target bundleno = 2 (0x2), region = 69 }

</bundles_post_ra>
